<compile_context>
chip_gen: v6e
topology: v6e:2x2x1
jax: 0.10.0
libtpu: 0.0.40
codegen_flags: <defaults>
</compile_context>

<pallas_src>
import math

import jax
import jax.numpy as jnp
from jax.experimental import pallas as pl
from jax.experimental.pallas import tpu as pltpu


def _apply_activation(h, activation):
    a = activation.lower()
    if a == "relu":
        return jnp.maximum(h, 0.0)
    if a == "elu":
        return jnp.where(h > 0, h, jnp.expm1(h))
    if a == "selu":
        alpha = 1.6732632423543772
        scale = 1.0507009873554805
        return scale * jnp.where(h > 0, h, alpha * jnp.expm1(h))
    if a == "gelu":
        return jax.nn.gelu(h, approximate=False)
    raise ValueError(
        "The activation must have one of the following string: relu, elu, selu, gelu")


def _fused_map_kernel(x_ref, w_ref, b_ref, out_ref, acc_ref,
                      *, use_activation, activation):
    k = pl.program_id(0)

    @pl.when(k == 0)
    def _():
        acc_ref[...] = jnp.zeros_like(acc_ref)

    h = x_ref[...]
    if use_activation:
        # Elementwise, so applying it per K-tile is exact.  All supported
        # activations map 0 -> 0, and padded weight rows are zero, so the
        # zero-padding along N stays inert either way.
        h = _apply_activation(h, activation)

    # Single fused matmul: (B, tk) @ (tk, 2*Hd_pad), f32 accumulate on the MXU.
    acc_ref[...] += jnp.dot(h, w_ref[...], preferred_element_type=jnp.float32)

    @pl.when(k == pl.num_programs(0) - 1)
    def _():
        out_ref[...] = (acc_ref[...] + b_ref[...]).astype(out_ref.dtype)


def map_to_distribution_parameters_with_vector(
        x, w_mu, b_mu, w_sigma, b_sigma,
        *, use_activation=False, activation="elu", tk=512):
    """x: (B, D, H, W).  w_*: (N, hidden) [transposed vs PyTorch], b_*: (hidden,)."""
    B = x.shape[0]
    N = x.shape[1] * x.shape[2] * x.shape[3]
    Hd = w_mu.shape[1]
    Hd2 = 2 * Hd

    # --- wrapper-side layout plumbing (no compute hoisted out of the kernel) ---
    x_flat = x.reshape(B, N)                          # NCHW contiguous flatten
    w = jnp.concatenate([w_mu, w_sigma], axis=1)      # (N, 2*Hd) fused weights
    b = jnp.concatenate([b_mu, b_sigma], axis=0)      # (2*Hd,)

    # Pad fused output dim to a lane-dense multiple of 128.
    Hd2_pad = max(128, ((Hd2 + 127) // 128) * 128)
    if Hd2_pad != Hd2:
        w = jnp.pad(w, ((0, 0), (0, Hd2_pad - Hd2)))
        b = jnp.pad(b, (0, Hd2_pad - Hd2))
    b2 = b.reshape(1, Hd2_pad)

    # K tile: multiple of 128 lanes; pad N with zeros (inert) to a multiple.
    tk = max(128, min(tk, N))
    tk = (tk // 128) * 128
    n_pad = ((N + tk - 1) // tk) * tk
    if n_pad != N:
        x_flat = jnp.pad(x_flat, ((0, 0), (0, n_pad - N)))
        w = jnp.pad(w, ((0, n_pad - N), (0, 0)))
    n_steps = n_pad // tk

    kernel = lambda *refs: _fused_map_kernel(
        *refs, use_activation=use_activation, activation=activation)

    out = pl.pallas_call(
        kernel,
        out_shape=jax.ShapeDtypeStruct((B, Hd2_pad), jnp.float32),
        grid=(n_steps,),
        in_specs=[
            pl.BlockSpec((B, tk), lambda k: (0, k)),          # x tile
            pl.BlockSpec((tk, Hd2_pad), lambda k: (k, 0)),    # fused W tile
            pl.BlockSpec((1, Hd2_pad), lambda k: (0, 0)),     # bias (resident)
        ],
        out_specs=pl.BlockSpec((B, Hd2_pad), lambda k: (0, 0)),
        scratch_shapes=[pltpu.VMEM((B, Hd2_pad), jnp.float32)],
        compiler_params=pltpu.CompilerParams(
            dimension_semantics=("arbitrary",)),
        # TODO(synk): for large B add a leading "parallel" grid axis over rows
        # so v7x's second TensorCore is used; B=2 here makes it a no-op.
    )(x_flat, w, b2)

    mu = out[:, :Hd]
    sigma = out[:, Hd:Hd2]
    return mu, sigma


def _init_linear_params(key, n_in, n_out):
    # PyTorch nn.Linear default: U(-1/sqrt(n_in), 1/sqrt(n_in)) for W and b.
    bound = 1.0 / math.sqrt(n_in)
    kw, kb = jax.random.split(key)
    # stored as (n_in, n_out) = transpose of PyTorch's (n_out, n_in)
    w = jax.random.uniform(kw, (n_in, n_out), jnp.float32, -bound, bound)
    b = jax.random.uniform(kb, (n_out,), jnp.float32, -bound, bound)
    return w, b


if __name__ == "__main__":
    key = jax.random.PRNGKey(0)
    B, D, H, W = 2, 4, 16, 16
    hidden_space_dimension = 32
    N = D * H * W

    k_x, k_mu, k_sig = jax.random.split(key, 3)
    x = jax.random.normal(k_x, (B, D, H, W), jnp.float32)
    w_mu, b_mu = _init_linear_params(k_mu, N, hidden_space_dimension)
    w_sigma, b_sigma = _init_linear_params(k_sig, N, hidden_space_dimension)

    # --- default path: use_activation=False (Identity) ---
    mu, sigma = map_to_distribution_parameters_with_vector(
        x, w_mu, b_mu, w_sigma, b_sigma, use_activation=False, activation="elu")
    jax.block_until_ready((mu, sigma))

    x_flat = x.reshape(B, N)
    mu_ref = x_flat @ w_mu + b_mu
    sig_ref = x_flat @ w_sigma + b_sigma
    assert jnp.allclose(mu, mu_ref, atol=1e-4), "mu mismatch"
    assert jnp.allclose(sigma, sig_ref, atol=1e-4), "sigma mismatch"

    # --- activation path: ELU then Linear ---
    mu_a, sigma_a = map_to_distribution_parameters_with_vector(
        x, w_mu, b_mu, w_sigma, b_sigma, use_activation=True, activation="elu")
    jax.block_until_ready((mu_a, sigma_a))

    h_ref = jnp.where(x_flat > 0, x_flat, jnp.expm1(x_flat))
    mu_a_ref = h_ref @ w_mu + b_mu
    sig_a_ref = h_ref @ w_sigma + b_sigma
    assert jnp.allclose(mu_a, mu_a_ref, atol=1e-4), "mu (elu) mismatch"
    assert jnp.allclose(sigma_a, sig_a_ref, atol=1e-4), "sigma (elu) mismatch"

    print("KERNEL_OK")
</pallas_src>

<mosaic_0001>
module attributes {stable_mosaic.version = 11 : i64} {
  func.func @_lambda_(%arg0: i32, %arg1: memref<2x512xf32, #tpu.memory_space<vmem>>, %arg2: memref<512x128xf32, #tpu.memory_space<vmem>>, %arg3: memref<1x128xf32, #tpu.memory_space<vmem>>, %arg4: memref<2x128xf32, #tpu.memory_space<vmem>>, %arg5: memref<2x128xf32, #tpu.memory_space<vmem>>) attributes {dimension_semantics = [#tpu.dimension_semantics<arbitrary>], iteration_bounds = array<i64: 2>, scalar_prefetch = 0 : i64, scratch_operands = 1 : i64, tpu.core_type = #tpu.core_type<tc>, window_params = [{transform_indices = @transform_0, window_bounds = array<i64: 2, 512>}, {transform_indices = @transform_1, window_bounds = array<i64: 512, 128>}, {pipeline_mode = #tpu.pipeline_mode<synchronous>, transform_indices = @transform_2, window_bounds = array<i64: 1, 128>}, {pipeline_mode = #tpu.pipeline_mode<synchronous>, transform_indices = @transform_3, window_bounds = array<i64: 2, 128>}]} {
    %c0_i32 = arith.constant 0 : i32
    %0 = arith.cmpi eq, %arg0, %c0_i32 : i32
    %1 = arith.extui %0 : i1 to i32
    %c0_i32_0 = arith.constant 0 : i32
    %2 = arith.cmpi ne, %1, %c0_i32_0 : i32
    scf.if %2 {
      %cst_9 = arith.constant 0.000000e+00 : f32
      %12 = vector.broadcast %cst_9 : f32 to vector<2x128xf32>
      %c0_10 = arith.constant 0 : index
      %c0_11 = arith.constant 0 : index
      %13 = vector.load %arg5[%c0_10, %c0_11] : memref<2x128xf32, #tpu.memory_space<vmem>>, vector<2x128xf32>
      tpu.vector_store %arg5[%c0_10, %c0_11], %12 {strides = array<i32>} : memref<2x128xf32, #tpu.memory_space<vmem>>, vector<2x128xf32>,
    } else {
    }
    %c0 = arith.constant 0 : index
    %c0_1 = arith.constant 0 : index
    %3 = vector.load %arg1[%c0, %c0_1] : memref<2x512xf32, #tpu.memory_space<vmem>>, vector<2x512xf32>
    %c0_2 = arith.constant 0 : index
    %c0_3 = arith.constant 0 : index
    %4 = vector.load %arg5[%c0_2, %c0_3] : memref<2x128xf32, #tpu.memory_space<vmem>>, vector<2x128xf32>
    %c0_4 = arith.constant 0 : index
    %c0_5 = arith.constant 0 : index
    %5 = vector.load %arg2[%c0_4, %c0_5] : memref<512x128xf32, #tpu.memory_space<vmem>>, vector<512x128xf32>
    %cst = arith.constant dense<0.000000e+00> : vector<2x128xf32>
    %6 = tpu.matmul %3, %5, %cst {dimension_numbers = #tpu.dot_dimension_numbers<[1], [0], [0], [1], [0, 0, 1, 1], [], []>} : vector<2x512xf32>, vector<512x128xf32>, vector<2x128xf32> -> vector<2x128xf32>
    %7 = arith.addf %4, %6 : vector<2x128xf32>
    %c0_6 = arith.constant 0 : index
    %c0_7 = arith.constant 0 : index
    %8 = vector.load %arg5[%c0_6, %c0_7] : memref<2x128xf32, #tpu.memory_space<vmem>>, vector<2x128xf32>
    tpu.vector_store %arg5[%c0_6, %c0_7], %7 {strides = array<i32>} : memref<2x128xf32, #tpu.memory_space<vmem>>, vector<2x128xf32>,
    %c1_i32 = arith.constant 1 : i32
    %9 = arith.cmpi eq, %arg0, %c1_i32 : i32
    %10 = arith.extui %9 : i1 to i32
    %c0_i32_8 = arith.constant 0 : i32
    %11 = arith.cmpi ne, %10, %c0_i32_8 : i32
    scf.if %11 {
      %c0_9 = arith.constant 0 : index
      %c0_10 = arith.constant 0 : index
      %12 = vector.load %arg5[%c0_9, %c0_10] : memref<2x128xf32, #tpu.memory_space<vmem>>, vector<2x128xf32>
      %c0_11 = arith.constant 0 : index
      %c0_12 = arith.constant 0 : index
      %13 = vector.load %arg3[%c0_11, %c0_12] : memref<1x128xf32, #tpu.memory_space<vmem>>, vector<1x128xf32>
      %14 = vector.broadcast %13 : vector<1x128xf32> to vector<2x128xf32>
      %15 = arith.addf %12, %14 : vector<2x128xf32>
      %c0_13 = arith.constant 0 : index
      %c0_14 = arith.constant 0 : index
      %16 = vector.load %arg4[%c0_13, %c0_14] : memref<2x128xf32, #tpu.memory_space<vmem>>, vector<2x128xf32>
      tpu.vector_store %arg4[%c0_13, %c0_14], %15 {strides = array<i32>} : memref<2x128xf32, #tpu.memory_space<vmem>>, vector<2x128xf32>,
    } else {
    }
    return
  }
  func.func @transform_0(%arg0: i32) -> (i32, i32) {
    %c0_i32 = arith.constant 0 : i32
    %c0_i32_0 = arith.constant 0 : i32
    return %c0_i32, %arg0 : i32, i32
  }
  func.func @transform_1(%arg0: i32) -> (i32, i32) {
    %c0_i32 = arith.constant 0 : i32
    %c0_i32_0 = arith.constant 0 : i32
    return %arg0, %c0_i32 : i32, i32
  }
  func.func @transform_2(%arg0: i32) -> (i32, i32) {
    %c0_i32 = arith.constant 0 : i32
    %c0_i32_0 = arith.constant 0 : i32
    %c0_i32_1 = arith.constant 0 : i32
    return %c0_i32, %c0_i32_0 : i32, i32
  }
  func.func @transform_3(%arg0: i32) -> (i32, i32) {
    %c0_i32 = arith.constant 0 : i32
    %c0_i32_0 = arith.constant 0 : i32
    %c0_i32_1 = arith.constant 0 : i32
    return %c0_i32, %c0_i32_0 : i32, i32
  }
}

</mosaic_0001>

<bundles_post_ra>
// kernel: tpu_custom_call.1
= control target key start
LH: loop header
LB: loop body
LE: loop exit
PB: predicated region body
PF: predicated region fallthrough
CT: control target
= control target key end

     0   :  { %8 = vsyncpa [#allocation4], 0  ;;  %s1079_s0 = inlined_call_operand.hbm [shape: f32[2,1024], index: 0, kind: input, shape index: {}]   ;;  %s1080_s1 = inlined_call_operand.hbm [shape: f32[1024,128], index: 1, kind: input, shape index: {}]   ;;  %s1081_s2 = inlined_call_operand.vmem [shape: f32[1,128], index: 2, kind: input, shape index: {}]   ;;  %s1082_s3 = inlined_call_operand.hbm [shape: f32[2,128], index: 3, kind: output, shape index: {}]  }
   0x1   :  { %10 = vsyncpa [#allocation4 + $0x1], 0 }
   0x2   :  { %11 = vsyncpa [#allocation7], 0 }
   0x3   :  { %13 = vsyncpa [#allocation7 + $0x1], 0 }
   0x4   :  { %14 = vsyncpa [#allocation5], 0  ;;  %s844_s12 = smov 0   ;;  %s846_s13 = smov 0  }
   0x5   :  { %s848_s14 = smov 0   ;;  %s850_s15 = smov 0  }
   0x6 LB: > { %s863_s16 = sadd.s32 4294967295, %s815_s15   ;;  %s866_s17 = sadd.s32 1, %s815_s15   ;;  %s815_s15 = sphi %s850_s15, %s1093_s15   ;;  %s811_s14 = sphi %s848_s14, %s1092_s14   ;;  %s807_s13 = sphi %s846_s13, %s1091_s13   ;;  %s803_s12 = sphi %s844_s12, %s1090_s12  }
   0x7   : > { %s24_s18 = ssub.s32 %s815_s15, %s866_s17  ;;  %s27_s19 = sadd.s32 1, %s811_s14 }
   0x8   : > { %p25_p0 = scmp.eq.s32.totalorder %s24_s18, 0  ;;  %p34_p1 = scmp.ne.s32.totalorder %s811_s14, %s807_s13 }
   0x9   : > { %p35_p2 = scmp.eq.s32.totalorder %s815_s15, 0  ;;  %p40_p3 = scmp.ne.s32.totalorder %s807_s13, %s803_s12 }
   0xa   : > { %s876_s20 = scalar_select %p25_p0, %s811_s14, %s27_s19  }
   0xb   : > { %p36_p4 = por %p35_p2, %p34_p1  ;;  %p41_p5 = scmp.eq.s32.totalorder %s863_s16, 0 }
   0xc   : > { %p652_p6 = scmp.lt.s32.totalorder %s815_s15, 2  ;;  %s885_s22 = sand.u32 1, %s811_s14  }
   0xd   : > { %p880_p7 = por %p41_p5, %p40_p3  ;;  %s549_s23 = sshll.u32 %s885_s22, 3 }
   0xe   : > { %s565_s24 = sshll.u32 %s815_s15, 7  ;;  %s139_s28 = scalar_lea.vmem [#allocation3], %s549_s23 }
   0xf   : > { %s1084_s21 = scalar_select %p880_p7, 1, 0 }
  0x10   : > { %s892_s27 = scalar_lea.hbm %s1079_s0, %s565_s24  ;;  %s147_s29 = sshll.u32 %s139_s28, 4  ;;  %s894_s29 = int_to_ptr.vmem [resolvable:$true] %s147_s29 }
  0x11   : > { %p896_p8 = pnand %p652_p6, %p36_p4  ;;  %s136_s4 = scalar_lea.sflag [#allocation4], %s885_s22 }
  0x12   : > { %s693_s5 = scalar_lea.hbm %s892_s27, 128  ;;  %s698_s8 = scalar_lea.hbm %s1079_s0, 256 }
  0x13   : > { %p694_p11 = scmp.ne.s32.totalorder %s892_s27, %s693_s5  ;;  %p695_p12 = pneg %p896_p8 }
  0x14   : > { %p699_p1 = scmp.lt.s32.totalorder %s892_s27, %s1079_s0  ;;  %p700_p2 = scmp.lt.s32.totalorder %s698_s8, %s693_s5 }
  0x15   : > { %p696_p13 = pnand %p695_p12, %p694_p11 }
  0x16   : > { %p701_p3 = por %p700_p2, %p699_p1 }
  0x17   : > { %p697_p0 = pneg %p696_p13 }
  0x19   : > { %p702_p4 = pnand %p701_p3, %p697_p0 }
  0x1b   : > { %705 = shalt.err (!%p702_p4)
}
  0x1c   : > { %s706_s11 = scalar_lea.vmem %s894_s29, 128  ;;  %s817_s12 = smov [#allocation3]  }
  0x1d   : > { %p707_p5 = scmp.ne.s32.totalorder %s894_s29, %s706_s11  ;;  %s711_s18 = sshll.u32 %s817_s12, 4  ;;  %s712_s18 = int_to_ptr.vmem [resolvable:$false] %s711_s18 }
  0x1e   : > { %s713_s19 = scalar_lea.vmem %s712_s18, 256  ;;  %p714_p13 = scmp.lt.s32.totalorder %s894_s29, %s712_s18 }
  0x1f   : > { %p709_p6 = pnand %p707_p5, %p695_p12  ;;  %p715_p9 = scmp.lt.s32.totalorder %s713_s19, %s706_s11 }
  0x21   : > { %p710_p11 = pneg %p709_p6  ;;  %p716_p10 = por %p715_p9, %p714_p13 }
  0x23   : > { %p717_p1 = pnand %p716_p10, %p710_p11 }
  0x25   : > { %720 = shalt.err (!%p717_p1)
}
  0x26   : > { %648 = dma.hbm_to_vmem [thread:$0]  (!%p896_p8), %s892_s27, 128, %s894_s29, %s136_s4  }
  0x27   : > { %p1086_p0 = scmp.lt.s32.totalorder %s815_s15, 3  ;;  %p1087_p2 = scmp.ge.s32.totalorder %s815_s15, 1 }
  0x28   : > { %s552_s24 = sshll.u32 %s885_s22, 9  ;;  %s566_s25 = sshll.u32 %s815_s15, 13 }
  0x29   : > { %p931_p3 = pnand %p1087_p2, %p1086_p0  ;;  %s940_s5 = scalar_lea.hbm %s1080_s1, %s566_s25 }
  0x2a   : > { %s158_s6 = scalar_lea.vmem [#allocation6], %s552_s24  ;;  %s155_s27 = scalar_lea.sflag [#allocation7], %s885_s22 }
  0x2b   : > { %s165_s7 = sshll.u32 %s158_s6, 4  ;;  %s721_s29 = scalar_lea.hbm %s940_s5, 8192  ;;  %s942_s7 = int_to_ptr.vmem [resolvable:$true] %s165_s7 }
  0x2c   : > { %p722_p9 = scmp.ne.s32.totalorder %s940_s5, %s721_s29  ;;  %s726_s8 = scalar_lea.hbm %s1080_s1, 16384 }
  0x2d   : > { %p727_p5 = scmp.lt.s32.totalorder %s940_s5, %s1080_s1  ;;  %p728_p6 = scmp.lt.s32.totalorder %s726_s8, %s721_s29 }
  0x2e   : > { %p724_p10 = pnand %p722_p9, %p695_p12 }
  0x2f   : > { %p729_p11 = por %p728_p6, %p727_p5 }
  0x30   : > { %p725_p4 = pneg %p724_p10 }
  0x32   : > { %p730_p13 = pnand %p729_p11, %p725_p4 }
  0x34   : > { %733 = shalt.err (!%p730_p13)
}
  0x35   : > { %s734_s11 = scalar_lea.vmem %s942_s7, 8192  ;;  %s818_s12 = smov [#allocation6]  }
  0x36   : > { %p735_p1 = scmp.ne.s32.totalorder %s942_s7, %s734_s11  ;;  %s739_s18 = sshll.u32 %s818_s12, 4  ;;  %s740_s18 = int_to_ptr.vmem [resolvable:$false] %s739_s18 }
  0x37   : > { %s741_s19 = scalar_lea.vmem %s740_s18, 16384  ;;  %p742_p9 = scmp.lt.s32.totalorder %s942_s7, %s740_s18 }
  0x38   : > { %p737_p0 = pnand %p735_p1, %p695_p12  ;;  %p743_p10 = scmp.lt.s32.totalorder %s741_s19, %s734_s11 }
  0x3a   : > { %p738_p2 = pneg %p737_p0  ;;  %p744_p7 = por %p743_p10, %p742_p9 }
  0x3c   : > { %p745_p5 = pnand %p744_p7, %p738_p2 }
  0x3e   : > { %748 = shalt.err (!%p745_p5)
}
  0x3f   : > { %s819_s24 = smov 128   ;;  %s820_s25 = smov 8  }
  0x40   : > { %651 = dma.hbm_to_vmem [thread:$0]  (!%p896_p8), %s940_s5, 8192, %s942_s7, %s155_s27, %s819_s24, %s819_s24, %s820_s25  }
  0x41   : > { %177 = sbr.rel (%p931_p3) target bundleno = 346 (0x15a), region = 32  ;;  %s179_s26 = sand.u32 (!%p931_p3), 1, %s807_s13  }
  0x42   : > { %s556_s28 = sshll.u32 (!%p931_p3), %s179_s26, 3  ;;  %s180_s6 = scalar_lea.sflag (!%p931_p3), [#allocation4], %s179_s26 }
  0x43   : > { %s972_s29 = scalar_lea.vmem (!%p931_p3), [#allocation3], %s556_s28  ;;  %p1089_p7 = scmp.ne.s32.totalorder (!%p931_p3), %s1084_s21, 0 }
  0x46   : > { %790 = dma.done.wait (%p1089_p7), %s180_s6, 128  }
  0x47   : > { %792 = vsyncadd (%p1089_p7), %s180_s6, 4294967168  ;;  %s557_s15 = sshll.u32 %s179_s26, 9  ;;  %s189_s30 = scalar_lea.sflag [#allocation7], %s179_s26 }
  0x48   : > { %s978_s22 = scalar_lea.vmem [#allocation6], %s557_s15 }
  0x49   : > { %794 = dma.done.wait (%p1089_p7), %s189_s30, 8192  }
  0x4a   : > { %796 = vsyncadd (%p1089_p7), %s189_s30, 4294959104  ;;  %p558_p8 = scmp.ne.s32.totalorder %s863_s16, 0 }
  0x4c   : > { %220 = sbr.rel (%p558_p8) target bundleno = 83 (0x53), region = 44 }
  0x51   : > { %v821_v0 = vmov 0.0  }
  0x52   : > { %221 = vst [vmem:[#allocation2] sm:$0x3] %v821_v0 }
  0x53 PF: > { %v255_v1 = vld [vmem:[%s978_s22 + $0xf8] sm:$0xff]  ;;  %v254_v5 = vld [vmem:[%s978_s22 + $0xf0] sm:$0xff]  ;;  %v253_v9 = vld [vmem:[%s978_s22 + $0xe8] sm:$0xff]  ;;  %v822_v31 = vmov 1983009808   ;;  %v293_v33 = vlaneseq  ;;  %p559_p12 = scmp.ne.s32.totalorder %s863_s16, 1 }
  0x54   : > { %v287_v2 = vld [vmem:[%s978_s22 + $0x1f8] sm:$0xff]  ;;  %567 = vmatprep.subr.mxu0 %v255_v1  ;;  %v286_v6 = vld [vmem:[%s978_s22 + $0x1f0] sm:$0xff]  ;;  %v285_v10 = vld [vmem:[%s978_s22 + $0x1e8] sm:$0xff]  ;;  %v291_v32 = vunpack.c.l.s4 %v822_v31 }
  0x55   : > { %v239_v3 = vld [vmem:[%s978_s22 + $0x78] sm:$0xff]  ;;  %602 = vmatprep.subr.mxu1 %v287_v2  ;;  %v238_v7 = vld [vmem:[%s978_s22 + $0x70] sm:$0xff]  ;;  %v237_v11 = vld [vmem:[%s978_s22 + $0x68] sm:$0xff]  ;;  %v294_v43 = vshrl.u32 %v293_v33, 7 }
  0x56   : > { %v271_v4 = vld [vmem:[%s978_s22 + $0x178] sm:$0xff]  ;;  %568 = vmatpush3.msra.mxu0 %v239_v3  ;;  %v270_v8 = vld [vmem:[%s978_s22 + $0x170] sm:$0xff]  ;;  %v269_v12 = vld [vmem:[%s978_s22 + $0x168] sm:$0xff]  ;;  %v292_v42 = vunpack.c.0.s8 %v291_v32 }
  0x57   : > { %603 = vmatpush3.msra.mxu1 %v271_v4  ;;  %569 = vmatprep.subr.mxu0 %v254_v5  ;;  %v252_v13 = vld [vmem:[%s978_s22 + $0xe0] sm:$0xff]  ;;  %v251_v17 = vld [vmem:[%s978_s22 + $0xd8] sm:$0xff]  ;;  %v250_v21 = vld [vmem:[%s978_s22 + $0xd0] sm:$0xff] }
  0x58   : > { %604 = vmatprep.subr.mxu1 %v286_v6  ;;  %570 = vmatpush3.msra.mxu0 %v238_v7  ;;  %v284_v14 = vld [vmem:[%s978_s22 + $0x1e0] sm:$0xff]  ;;  %v283_v18 = vld [vmem:[%s978_s22 + $0x1d8] sm:$0xff]  ;;  %v282_v22 = vld [vmem:[%s978_s22 + $0x1d0] sm:$0xff]  ;;  %v295_v52 = vsub.s32 %v292_v42, %v294_v43 }
  0x59   : > { %605 = vmatpush3.msra.mxu1 %v270_v8  ;;  %571 = vmatprep.subr.mxu0 %v253_v9  ;;  %v236_v15 = vld [vmem:[%s978_s22 + $0x60] sm:$0xff]  ;;  %v235_v19 = vld [vmem:[%s978_s22 + $0x58] sm:$0xff]  ;;  %v234_v23 = vld [vmem:[%s978_s22 + $0x50] sm:$0xff] }
  0x5a   : > { %606 = vmatprep.subr.mxu1 %v285_v10  ;;  %v268_v16 = vld [vmem:[%s978_s22 + $0x160] sm:$0xff]  ;;  %572 = vmatpush3.msra.mxu0 %v237_v11  ;;  %v267_v20 = vld [vmem:[%s978_s22 + $0x158] sm:$0xff]  ;;  %v266_v24 = vld [vmem:[%s978_s22 + $0x150] sm:$0xff] }
  0x5b   : > { %607 = vmatpush3.msra.mxu1 %v269_v12  ;;  %573 = vmatprep.subr.mxu0 %v252_v13  ;;  %v249_v25 = vld [vmem:[%s978_s22 + $0xc8] sm:$0xff]  ;;  %v248_v29 = vld [vmem:[%s978_s22 + $0xc0] sm:$0xff]  ;;  %v247_v36 = vld [vmem:[%s978_s22 + $0xb8] sm:$0xff] }
  0x5c   : > { %608 = vmatprep.subr.mxu1 %v284_v14  ;;  %574 = vmatpush3.msra.mxu0 %v236_v15  ;;  %v281_v26 = vld [vmem:[%s978_s22 + $0x1c8] sm:$0xff]  ;;  %v280_v30 = vld [vmem:[%s978_s22 + $0x1c0] sm:$0xff]  ;;  %v279_v37 = vld [vmem:[%s978_s22 + $0x1b8] sm:$0xff] }
  0x5d   : > { %609 = vmatpush3.msra.mxu1 %v268_v16  ;;  %575 = vmatprep.subr.mxu0 %v251_v17  ;;  %v233_v27 = vld [vmem:[%s978_s22 + $0x48] sm:$0xff]  ;;  %v232_v34 = vld [vmem:[%s978_s22 + $0x40] sm:$0xff]  ;;  %v231_v38 = vld [vmem:[%s978_s22 + $0x38] sm:$0xff] }
  0x5e   : > { %610 = vmatprep.subr.mxu1 %v283_v18  ;;  %576 = vmatpush3.msra.mxu0 %v235_v19  ;;  %v265_v28 = vld [vmem:[%s978_s22 + $0x148] sm:$0xff]  ;;  %v264_v35 = vld [vmem:[%s978_s22 + $0x140] sm:$0xff]  ;;  %v263_v39 = vld [vmem:[%s978_s22 + $0x138] sm:$0xff] }
  0x5f   : > { %611 = vmatpush3.msra.mxu1 %v267_v20  ;;  %577 = vmatprep.subr.mxu0 %v250_v21  ;;  %v246_v40 = vld [vmem:[%s978_s22 + $0xb0] sm:$0xff]  ;;  %v245_v46 = vld [vmem:[%s978_s22 + $0xa8] sm:$0xff]  ;;  %v244_v50 = vld [vmem:[%s978_s22 + $0xa0] sm:$0xff] }
  0x60   : > { %612 = vmatprep.subr.mxu1 %v282_v22  ;;  %578 = vmatpush3.msra.mxu0 %v234_v23  ;;  %v278_v41 = vld [vmem:[%s978_s22 + $0x1b0] sm:$0xff]  ;;  %v277_v47 = vld [vmem:[%s978_s22 + $0x1a8] sm:$0xff]  ;;  %v276_v51 = vld [vmem:[%s978_s22 + $0x1a0] sm:$0xff] }
  0x61   : > { %613 = vmatpush3.msra.mxu1 %v266_v24  ;;  %579 = vmatprep.subr.mxu0 %v249_v25  ;;  %v230_v44 = vld [vmem:[%s978_s22 + $0x30] sm:$0xff]  ;;  %v229_v48 = vld [vmem:[%s978_s22 + $0x28] sm:$0xff]  ;;  %v228_v53 = vld [vmem:[%s978_s22 + $0x20] sm:$0xff] }
  0x62   : > { %614 = vmatprep.subr.mxu1 %v281_v26  ;;  %580 = vmatpush3.msra.mxu0 %v233_v27  ;;  %v262_v45 = vld [vmem:[%s978_s22 + $0x130] sm:$0xff]  ;;  %v261_v49 = vld [vmem:[%s978_s22 + $0x128] sm:$0xff]  ;;  %v260_v54 = vld [vmem:[%s978_s22 + $0x120] sm:$0xff] }
  0x63   : > { %615 = vmatpush3.msra.mxu1 %v265_v28  ;;  %581 = vmatprep.subr.mxu0 %v248_v29  ;;  %v222_v55 = vld [vmem:[%s972_s29] sm:$0xff]  ;;  %v241_v3 = vld [vmem:[%s978_s22 + $0x88] sm:$0xff]  ;;  %v240_v7 = vld [vmem:[%s978_s22 + $0x80] sm:$0xff] }
  0x64   : > { %616 = vmatprep.subr.mxu1 %v280_v30  ;;  %582 = vmatpush3.msra.mxu0 %v232_v34  ;;  %v243_v56 = vld [vmem:[%s978_s22 + $0x98] sm:$0xff]  ;;  %v289_v58 = vcombine.high %v222_v55, %v222_v55  ;;  %v242_v61 = vld [vmem:[%s978_s22 + $0x90] sm:$0xff]  ;;  %v296_v63 = vrot.slane %v222_v55, %v295_v52  ;;  %v273_v4 = vld [vmem:[%s978_s22 + $0x188] sm:$0xff] }
  0x65   : > { %617 = vmatpush3.msra.mxu1 %v264_v35  ;;  %583 = vmatprep.subr.mxu0 %v247_v36  ;;  %v275_v57 = vld [vmem:[%s978_s22 + $0x198] sm:$0xff]  ;;  %v274_v62 = vld [vmem:[%s978_s22 + $0x190] sm:$0xff]  ;;  %v225_v5 = vld [vmem:[%s978_s22 + $0x8] sm:$0xff] }
  0x66   : > { %618 = vmatprep.subr.mxu1 %v279_v37  ;;  %584 = vmatpush3.msra.mxu0 %v231_v38  ;;  %v227_v59 = vld [vmem:[%s978_s22 + $0x18] sm:$0xff]  ;;  %v226_v0 = vld [vmem:[%s978_s22 + $0x10] sm:$0xff]  ;;  %v303_v2 = vrot.slane %v289_v58, %v295_v52  ;;  %v257_v6 = vld [vmem:[%s978_s22 + $0x108] sm:$0xff]  ;;  %v304_v9 = vcombine.high %v296_v63, %v296_v63 }
  0x67   : > { %619 = vmatpush3.msra.mxu1 %v263_v39  ;;  %585 = vmatprep.subr.mxu0 %v246_v40  ;;  %v259_v60 = vld [vmem:[%s978_s22 + $0x118] sm:$0xff]  ;;  %v258_v1 = vld [vmem:[%s978_s22 + $0x110] sm:$0xff]  ;;  %v272_v8 = vld [vmem:[%s978_s22 + $0x180] sm:$0xff] }
  0x68   : > { %620 = vmatprep.subr.mxu1 %v278_v41  ;;  %586 = vmatpush3.msra.mxu0 %v230_v44  ;;  %v224_v10 = vld [vmem:[%s978_s22] sm:$0xff]  ;;  %v305_v11 = vcombine.high %v303_v2, %v303_v2  ;;  %v223_v19 = vld [vmem:[#allocation2] sm:$0x3] }
  0x69   : > { %621 = vmatpush3.msra.mxu1 %v262_v45  ;;  %587 = vmatprep.subr.mxu0 %v245_v46  ;;  %v256_v12 = vld [vmem:[%s978_s22 + $0x100] sm:$0xff] }
  0x6a   : > { %622 = vmatprep.subr.mxu1 %v277_v47  ;;  %588 = vmatpush3.msra.mxu0 %v229_v48 }
  0x6b   : > { %623 = vmatpush3.msra.mxu1 %v261_v49  ;;  %589 = vmatprep.subr.mxu0 %v244_v50 }
  0x6c   : > { %624 = vmatprep.subr.mxu1 %v276_v51  ;;  %590 = vmatpush3.msra.mxu0 %v228_v53 }
  0x6d   : > { %625 = vmatpush3.msra.mxu1 %v260_v54  ;;  %591 = vmatprep.subr.mxu0 %v243_v56 }
  0x6e   : > { %626 = vmatprep.subr.mxu1 %v275_v57  ;;  %592 = vmatpush3.msra.mxu0 %v227_v59 }
  0x6f   : > { %627 = vmatpush3.msra.mxu1 %v259_v60  ;;  %593 = vmatprep.subr.mxu0 %v242_v61 }
  0x70   : > { %628 = vmatprep.subr.mxu1 %v274_v62  ;;  %594 = vmatpush3.msra.mxu0 %v226_v0 }
  0x71   : > { %629 = vmatpush3.msra.mxu1 %v258_v1  ;;  %595 = vmatprep.subr.mxu0 %v241_v3 }
  0x72   : > { %630 = vmatprep.subr.mxu1 %v273_v4  ;;  %596 = vmatpush3.msra.mxu0 %v225_v5 }
  0x73   : > { %631 = vmatpush3.msra.mxu1 %v257_v6  ;;  %597 = vmatprep.subr.mxu0 %v240_v7 }
  0x74   : > { %632 = vmatprep.subr.mxu1 %v272_v8  ;;  %598 = vmatpush3.msra.mxu0 %v224_v10 }
  0x75   : > { %374 = vmatprep.mubr.f32.mxu0 %v304_v9  ;;  %633 = vmatpush3.msra.mxu1 %v256_v12 }
  0x76   : > { %444 = vmatprep.mubr.f32.mxu1 %v305_v11  ;;  %375 = vmatmul.mubr.f32.vlgmr.msra.gmra.mxu0 %v296_v63 }
  0x77   : > { %445 = vmatmul.mubr.f32.vlgmr.msra.gmra.mxu1 %v303_v2 }
 0x136   : > { %v599_v13 = vpop.f32.mrf.mxu0 }
 0x137   : > { %v634_v14 = vpop.f32.mrf.mxu1 }
 0x138   : > { %v600_v15 = vpop.f32.mrf.mxu0 }
 0x139   : > { %v635_v16 = vpop.f32.mrf.mxu1  ;;  %v601_v17 = vadd.f32 %v600_v15, %v599_v13 }
 0x13a   : > { %v636_v18 = vadd.f32 %v635_v16, %v634_v14 }
 0x13c   : > { %v447_v20 = vadd.f32 %v636_v18, %v601_v17  ;;  %455 = sbr.rel (%p559_p12) target bundleno = 331 (0x14b), region = 48 }
 0x13e   : > { %v450_v21 = vadd.f32 %v447_v20, %v223_v19 }
 0x140   : > { %451 = vst [vmem:[#allocation2] sm:$0x3] %v450_v21 }
 0x141   : > { %v560_v23 = vld [vmem:[%s1081_s2] ss:$0 sm:$0xff] }
 0x147   : > { %v456_v22 = vld [vmem:[#allocation2] sm:$0x3] }
 0x148   : > { %v464_v24 = vadd.f32 %v560_v23, %v456_v22 }
 0x14a   : > { %465 = vst [vmem:[#allocation8] sm:$0x3] %v464_v24 }
 0x14b PF: > { %p653_p3 = scmp.eq.s32.totalorder %s863_s16, 1  ;;  %s823_s5 = smov [#allocation8]  }
 0x14c   : > { %s473_s7 = sshll.u32 %s823_s5, 4  ;;  %s474_s7 = int_to_ptr.vmem [resolvable:$true] %s473_s7 }
 0x14d   : > { %s749_s27 = scalar_lea.vmem %s474_s7, 32  ;;  %p756_p13 = scmp.lt.s32.totalorder %s474_s7, %s474_s7 }
 0x14e   : > { %p750_p4 = scmp.ne.s32.totalorder %s474_s7, %s749_s27  ;;  %p757_p1 = scmp.lt.s32.totalorder %s749_s27, %s749_s27 }
 0x150   : > { %p751_p6 = pnand %p750_p4, %p653_p3  ;;  %p758_p0 = por %p757_p1, %p756_p13 }
 0x152   : > { %p752_p11 = pneg %p751_p6 }
 0x154   : > { %p759_p2 = pnand %p758_p0, %p752_p11 }
 0x156   : > { %762 = shalt.err (!%p759_p2)
}
 0x157   : > { %642 = dma.vmem_to_hbm [thread:$0]  (%p653_p3), %s474_s7, 32, %s1082_s3, [#allocation5]  }
 0x158   : > { %798 = dma.done.wait (%p653_p3), [#allocation5], 32  }
 0x159   : > { %800 = vsyncadd (%p653_p3), [#allocation5], 4294967264 }
 0x15a PF: > { %p17_p9 = scmp.ge.s32.totalorder %s866_s17, 4   ;;  %s1090_s12 = smov %s807_s13 }
 0x15b   : > { %s1091_s13 = smov %s811_s14  ;;  %s1092_s14 = smov %s876_s20 }
 0x15c   : > { %s1093_s15 = smov %s866_s17  ;;  %19 = sbr.rel (!%p17_p9) target bundleno = 6 (0x6), region = 90 }
 0x161   :  { %486 = vsyncpa [#allocation4], 1 }
 0x162   :  { %488 = vsyncpa [#allocation4 + $0x1], 1 }
 0x163   :  { %489 = vsyncpa [#allocation7], 1 }
 0x164   :  { %491 = vsyncpa [#allocation7 + $0x1], 1 }
 0x165   :  { %492 = vsyncpa [#allocation5], 1 }
 0x166   :  { %494 = vsyncpa [#allocation5 + $0x1], 1 }

</bundles_post_ra>
